<compile_context>
chip_gen: v6e
topology: v6e:2x2x1
jax: 0.10.0
libtpu: 0.0.40
codegen_flags: <defaults>
</compile_context>

<pallas_src>
import functools

import jax
import jax.numpy as jnp
from jax import lax
from jax.experimental import pallas as pl
from jax.experimental.pallas import tpu as pltpu


def _round_up(x, m):
    return ((x + m - 1) // m) * m


def _cross_entropy_kernel(pred_ref, tgt_ref, loss_ref, *,
                          n_valid, tile, n_inner, need_row_mask):
    j = pl.program_id(1)

    @pl.when(j == 0)
    def _():
        loss_ref[...] = jnp.zeros_like(loss_ref)

    # Per-tile cast (no-op for f32 inputs, bf16 stays bf16 in HBM/VMEM).
    logits = pred_ref[...].astype(jnp.float32)            # (tile, C)
    t, c = logits.shape

    # Numerically stable log-sum-exp per row, all in f32.
    m = jnp.max(logits, axis=-1, keepdims=True)            # (tile, 1)
    lse = m + jnp.log(jnp.sum(jnp.exp(logits - m), axis=-1, keepdims=True))

    # Select the target logit via a one-hot compare (no dynamic gather needed).
    col = lax.broadcasted_iota(jnp.int32, (t, c), 1)
    tgt = tgt_ref[...]                                      # (tile, 1) int32
    picked = jnp.sum(jnp.where(col == tgt, logits, 0.0), axis=-1, keepdims=True)

    per_row = lse - picked                                  # (tile, 1) NLL per row

    if need_row_mask:   # trace-time branch: only emitted when rows are padded/OOB
        i = pl.program_id(0)
        blk = i * n_inner + j
        row = lax.broadcasted_iota(jnp.int32, (t, 1), 0) + blk * tile
        per_row = jnp.where(row < n_valid, per_row, 0.0)

    # Accumulate this tile's partial sum into the split-resident block
    # (same value broadcast to every element; wrapper reads element [0, 0]).
    loss_ref[...] += jnp.sum(per_row, axis=(0, 1), keepdims=True)


def cross_entropy_loss(pred, target, *, block_rows=None,
                       vmem_budget_bytes=8 * 1024 * 1024):
    """pred: (N, C) float logits, target: (N,) int class indices -> scalar mean CE loss."""
    N, C = pred.shape
    dtype_bytes = jnp.dtype(pred.dtype).itemsize
    lanes = _round_up(C, 128)                 # VMEM lane footprint of one logits row

    # Row tile from a per-buffer VMEM budget (double-buffered by the pipeline).
    cap = max(8, vmem_budget_bytes // (lanes * dtype_bytes))
    cap = min(cap, 2048)
    if block_rows is not None:
        cap = min(cap, max(8, block_rows))
    if N <= cap:
        tile = N                              # single row block; full-dim block is always legal
    else:
        tile = max(8, (cap // 8) * 8)

    n_blocks = pl.cdiv(N, tile)
    if n_blocks >= 2:
        n_outer = 2                           # row-axis split across TensorCores (v7x)
        n_inner = pl.cdiv(n_blocks, 2)
    else:
        n_outer, n_inner = 1, 1
    need_row_mask = (n_outer * n_inner * tile != N)

    tgt = target.astype(jnp.int32).reshape(N, 1)

    kernel = functools.partial(
        _cross_entropy_kernel,
        n_valid=N, tile=tile, n_inner=n_inner, need_row_mask=need_row_mask)

    out = pl.pallas_call(
        kernel,
        out_shape=jax.ShapeDtypeStruct((n_outer * 8, 128), jnp.float32),
        grid_spec=pltpu.PrefetchScalarGridSpec(
            num_scalar_prefetch=0,
            grid=(n_outer, n_inner),
            in_specs=[
                # Logits: native dtype, last dim = full class extent (no padding copy).
                pl.BlockSpec((tile, C), lambda i, j: (i * n_inner + j, 0)),
                # Targets: narrow int32 stream, negligible traffic.
                pl.BlockSpec((tile, 1), lambda i, j: (i * n_inner + j, 0)),
            ],
            # One resident (8,128) accumulator block per outer split.
            out_specs=pl.BlockSpec((8, 128), lambda i, j: (i, 0)),
        ),
        compiler_params=pltpu.CompilerParams(
            dimension_semantics=("parallel", "arbitrary"),
            vmem_limit_bytes=32 * 1024 * 1024,
        ),
    )(pred, tgt)

    partials = out[::8, 0]                    # element [0, 0] of each split's block
    return jnp.sum(partials) / jnp.float32(N)   # mean reduction done in the wrapper


def cross_entropy_reference(pred, target):
    logp = jax.nn.log_softmax(pred.astype(jnp.float32), axis=-1)
    nll = -jnp.take_along_axis(logp, target[:, None].astype(jnp.int32), axis=-1)
    return jnp.mean(nll)


if __name__ == "__main__":
    key = jax.random.PRNGKey(0)

    # Case 1: small classifier (matches the module's typical use), f32, single block.
    k1, k2, k3, k4, k5, k6 = jax.random.split(key, 6)
    pred1 = jax.random.normal(k1, (16, 10), dtype=jnp.float32)
    tgt1 = jax.random.randint(k2, (16,), 0, 10, dtype=jnp.int32)
    loss1 = jax.block_until_ready(cross_entropy_loss(pred1, tgt1))
    ref1 = cross_entropy_reference(pred1, tgt1)
    assert loss1.shape == ()
    assert jnp.allclose(loss1, ref1, atol=1e-5, rtol=1e-5), (loss1, ref1)

    # Case 2: exercises the multi-block / two-split / row-mask path (uneven division).
    pred2 = jax.random.normal(k3, (200, 37), dtype=jnp.float32)
    tgt2 = jax.random.randint(k4, (200,), 0, 37, dtype=jnp.int32)
    loss2 = jax.block_until_ready(cross_entropy_loss(pred2, tgt2, block_rows=64))
    ref2 = cross_entropy_reference(pred2, tgt2)
    assert jnp.allclose(loss2, ref2, atol=1e-5, rtol=1e-5), (loss2, ref2)

    # Case 3: bf16 logits passed through unchanged (cast happens per-tile in-kernel).
    pred3 = jax.random.normal(k5, (64, 10), dtype=jnp.bfloat16)
    tgt3 = jax.random.randint(k6, (64,), 0, 10, dtype=jnp.int32)
    loss3 = jax.block_until_ready(cross_entropy_loss(pred3, tgt3, block_rows=16))
    ref3 = cross_entropy_reference(pred3, tgt3)
    assert jnp.allclose(loss3, ref3, atol=1e-4, rtol=1e-4), (loss3, ref3)

    print("KERNEL_OK")
</pallas_src>

<mosaic_0001>
module attributes {stable_mosaic.version = 11 : i64} {
  func.func @_cross_entropy_kernel(%arg0: i32, %arg1: i32, %arg2: memref<16x10xf32, #tpu.memory_space<vmem>>, %arg3: memref<16x1xi32, #tpu.memory_space<vmem>>, %arg4: memref<8x128xf32, #tpu.memory_space<vmem>>) attributes {dimension_semantics = [#tpu.dimension_semantics<parallel>, #tpu.dimension_semantics<arbitrary>], iteration_bounds = array<i64: 1, 1>, scalar_prefetch = 0 : i64, scratch_operands = 0 : i64, tpu.core_type = #tpu.core_type<tc>, window_params = [{transform_indices = @transform_0, window_bounds = array<i64: 16, 10>}, {transform_indices = @transform_1, window_bounds = array<i64: 16, 1>}, {transform_indices = @transform_2, window_bounds = array<i64: 8, 128>}]} {
    %c0_i32 = arith.constant 0 : i32
    %0 = arith.cmpi eq, %arg1, %c0_i32 : i32
    %1 = arith.extui %0 : i1 to i32
    %c0_i32_0 = arith.constant 0 : i32
    %2 = arith.cmpi ne, %1, %c0_i32_0 : i32
    scf.if %2 {
      %cst_12 = arith.constant 0.000000e+00 : f32
      %31 = vector.broadcast %cst_12 : f32 to vector<8x128xf32>
      %c0_13 = arith.constant 0 : index
      %c0_14 = arith.constant 0 : index
      %32 = vector.load %arg4[%c0_13, %c0_14] : memref<8x128xf32, #tpu.memory_space<vmem>>, vector<8x128xf32>
      tpu.vector_store %arg4[%c0_13, %c0_14], %31 {strides = array<i32>} : memref<8x128xf32, #tpu.memory_space<vmem>>, vector<8x128xf32>,
    } else {
    }
    %c0 = arith.constant 0 : index
    %c0_1 = arith.constant 0 : index
    %3 = vector.load %arg2[%c0, %c0_1] : memref<16x10xf32, #tpu.memory_space<vmem>>, vector<16x10xf32>
    %cst = arith.constant dense<0xFF800000> : vector<16xf32>
    %4 = vector.multi_reduction <maximumf>, %3, %cst [1] : vector<16x10xf32> to vector<16xf32>
    %5 = vector.shape_cast %4 : vector<16xf32> to vector<16x1xf32>
    %6 = vector.broadcast %5 : vector<16x1xf32> to vector<16x10xf32>
    %7 = arith.subf %3, %6 : vector<16x10xf32>
    %8 = math.exp %7 : vector<16x10xf32>
    %cst_2 = arith.constant dense<0.000000e+00> : vector<16xf32>
    %9 = vector.multi_reduction <add>, %8, %cst_2 [1] : vector<16x10xf32> to vector<16xf32>
    %10 = vector.shape_cast %9 : vector<16xf32> to vector<16x1xf32>
    %11 = math.log %10 : vector<16x1xf32>
    %12 = arith.addf %5, %11 : vector<16x1xf32>
    %13 = tpu.iota {dimensions = array<i32: 1>} : vector<16x10xi32>
    %c0_3 = arith.constant 0 : index
    %c0_4 = arith.constant 0 : index
    %14 = vector.load %arg3[%c0_3, %c0_4] : memref<16x1xi32, #tpu.memory_space<vmem>>, vector<16x1xi32>
    %15 = vector.broadcast %14 : vector<16x1xi32> to vector<16x10xi32>
    %16 = arith.cmpi eq, %13, %15 : vector<16x10xi32>
    %cst_5 = arith.constant 0.000000e+00 : f32
    %17 = vector.broadcast %cst_5 : f32 to vector<16x10xf32>
    %18 = arith.select %16, %3, %17 : vector<16x10xi1>, vector<16x10xf32>
    %cst_6 = arith.constant dense<0.000000e+00> : vector<16xf32>
    %19 = vector.multi_reduction <add>, %18, %cst_6 [1] : vector<16x10xf32> to vector<16xf32>
    %20 = vector.shape_cast %19 : vector<16xf32> to vector<16x1xf32>
    %21 = arith.subf %12, %20 : vector<16x1xf32>
    %c0_7 = arith.constant 0 : index
    %c0_8 = arith.constant 0 : index
    %22 = vector.load %arg4[%c0_7, %c0_8] : memref<8x128xf32, #tpu.memory_space<vmem>>, vector<8x128xf32>
    %23 = vector.shape_cast %21 : vector<16x1xf32> to vector<1x16x1xf32>
    %cst_9 = arith.constant dense<0.000000e+00> : vector<1xf32>
    %24 = vector.multi_reduction <add>, %23, %cst_9 [1, 2] : vector<1x16x1xf32> to vector<1xf32>
    %25 = vector.shape_cast %24 : vector<1xf32> to vector<1x1x1xf32>
    %26 = vector.extract %25[0, 0, 0] : f32 from vector<1x1x1xf32>
    %27 = vector.broadcast %26 : f32 to vector<1x1xf32>
    %28 = vector.broadcast %27 : vector<1x1xf32> to vector<8x128xf32>
    %29 = arith.addf %22, %28 : vector<8x128xf32>
    %c0_10 = arith.constant 0 : index
    %c0_11 = arith.constant 0 : index
    %30 = vector.load %arg4[%c0_10, %c0_11] : memref<8x128xf32, #tpu.memory_space<vmem>>, vector<8x128xf32>
    tpu.vector_store %arg4[%c0_10, %c0_11], %29 {strides = array<i32>} : memref<8x128xf32, #tpu.memory_space<vmem>>, vector<8x128xf32>,
    return
  }
  func.func @transform_0(%arg0: i32, %arg1: i32) -> (i32, i32) {
    %c1_i32 = arith.constant 1 : i32
    %0 = arith.muli %arg0, %c1_i32 : i32
    %1 = arith.addi %0, %arg1 : i32
    %c0_i32 = arith.constant 0 : i32
    %c0_i32_0 = arith.constant 0 : i32
    return %1, %c0_i32 : i32, i32
  }
  func.func @transform_1(%arg0: i32, %arg1: i32) -> (i32, i32) {
    %c1_i32 = arith.constant 1 : i32
    %0 = arith.muli %arg0, %c1_i32 : i32
    %1 = arith.addi %0, %arg1 : i32
    %c0_i32 = arith.constant 0 : i32
    %c0_i32_0 = arith.constant 0 : i32
    return %1, %c0_i32 : i32, i32
  }
  func.func @transform_2(%arg0: i32, %arg1: i32) -> (i32, i32) {
    %c0_i32 = arith.constant 0 : i32
    %c0_i32_0 = arith.constant 0 : i32
    return %arg0, %c0_i32 : i32, i32
  }
}

</mosaic_0001>

<bundles_post_ra>
// kernel: tpu_custom_call.1
= control target key start
LH: loop header
LB: loop body
LE: loop exit
PB: predicated region body
PF: predicated region fallthrough
CT: control target
= control target key end

     0   :  { %vm63_vm0 = vcmask 80896   ;;  %v190_v4 = vmov 0   ;;  %s228_s0 = inlined_call_operand.vmem [shape: f32[16,10], index: 0, kind: input, shape index: {}]   ;;  %s229_s1 = inlined_call_operand.vmem [shape: s32[16,1], index: 1, kind: input, shape index: {}]   ;;  %s230_s2 = inlined_call_operand.hbm [shape: f32[8,128], index: 2, kind: output, shape index: {}]  }
   0x1   :  { %v61_v0 = vld [vmem:[%s228_s0] sm:$0xff]  ;;  %v62_v1 = vld [vmem:[%s228_s0 + $0x8] sm:$0xff]  ;;  %158 = vset.pattern.permute.xlu1 %v190_v4  ;;  %159 = vset.pattern.permute.xlu0 %v190_v4 }
   0x2   :  { %v90_v2 = vld [vmem:[%s229_s1] sm:$0xff]  ;;  %v64_v3 = vsel %vm63_vm0, %v61_v0, -inf }
   0x3   :  { %7 = vsyncpa [#allocation3], 0  ;;  %65 = vmax.xlane.f32.xlu0 %v64_v3  ;;  %93 = vperm.xlu1 %158, %v90_v2   ;;  %v67_v5 = vsel %vm63_vm0, %v62_v1, -inf  ;;  %v91_v6 = vld [vmem:[%s229_s1 + $0x8] sm:$0xff]  ;;  %v88_v13 = vlaneseq  ;;  %vm111_vm3 = vcmask 7168   ;;  %s191_s0 = smov [#allocation2]  }
   0x4   :  { %s133_s1 = sshll.u32 %s191_s0, 4  ;;  %s134_s1 = int_to_ptr.vmem [resolvable:$true] %s133_s1 }
   0x5   :  { %v89_v15 = vand.u32 127, %v88_v13  ;;  %s168_s18 = scalar_lea.vmem %s134_s1, 128  ;;  %p173_p1 = scmp.lt.s32.totalorder %s134_s1, %s134_s1 }
   0x6   :  { %p169_p0 = scmp.ne.s32.totalorder %s134_s1, %s168_s18  ;;  %p174_p2 = scmp.lt.s32.totalorder %s168_s18, %s168_s18 }
   0x7   :  { %68 = vmax.xlane.f32.xlu0 %v67_v5  ;;  %96 = vperm.xlu1 %158, %v91_v6  }
   0x8   :  { %p175_p3 = por %p174_p2, %p173_p1 }
   0xa   :  { %p176_p4 = pnand %p175_p3, %p169_p0 }
  0x7e   :  { %v94_v14 = vpop.permute.xlu1 %93 }
  0x7f   :  { %vm98_vm1 = vcmp.eq.s32.totalorder %v89_v15, %v94_v14 }
  0x80   :  { %v100_v18 = vsel %vm98_vm1, %v61_v0, 0.0 }
  0x81   :  { %v102_v20 = vsel %vm63_vm0, %v100_v18, 0.0 }
  0x82   :  { %v97_v16 = vpop.permute.xlu1 %96 }
  0x83   :  { %vm99_vm2 = vcmp.eq.s32.totalorder %v89_v15, %v97_v16 }
  0x84   :  { %v101_v22 = vsel %vm99_vm2, %v62_v1, 0.0 }
  0x85   :  { %v105_v24 = vsel %vm63_vm0, %v101_v22, 0.0 }
  0x8c   :  { %v66_v7 = vpop.xlane.xlu0 %65 }
  0x8d   :  { %v70_v8 = vsub.f32 %v61_v0, %v66_v7 }
  0x8f   :  { %v72_v9 = vmul.f32 1.442695, %v70_v8 }
  0x90   :  { %v69_v10 = vpop.xlane.xlu0 %68 }
  0x91   :  { %160 = vpow2.f32 %v72_v9  ;;  %v71_v11 = vsub.f32 %v62_v1, %v69_v10 }
  0x93   :  { %v74_v12 = vmul.f32 1.442695, %v71_v11 }
  0x95   :  { %162 = vpow2.f32 %v74_v12 }
  0x9e   :  { %v161_v17 = vpop.eup %160 }
  0x9f   :  { %v76_v19 = vsel %vm63_vm0, %v161_v17, 0.0 }
  0xa0   :  { %77 = vadd.xlane.f32.xlu0 %v76_v19 }
  0xa2   :  { %v163_v21 = vpop.eup %162 }
  0xa3   :  { %v79_v23 = vsel %vm63_vm0, %v163_v21, 0.0 }
  0xa4   :  { %80 = vadd.xlane.f32.xlu1 %v79_v23  ;;  %103 = vadd.xlane.f32.xlu0 %v102_v20 }
  0xa8   :  { %106 = vadd.xlane.f32.xlu0 %v105_v24 }
 0x129   :  { %v78_v25 = vpop.xlane.xlu0 %77 }
 0x12a   :  { %164 = vlog2.f32 %v78_v25 }
 0x12d   :  { %v81_v26 = vpop.xlane.xlu1 %80  ;;  %v104_v29 = vpop.xlane.xlu0 %103 }
 0x12e   :  { %166 = vlog2.f32 %v81_v26 }
 0x131   :  { %v107_v35 = vpop.xlane.xlu0 %106 }
 0x137   :  { %v165_v27 = vpop.eup %164 }
 0x138   :  { %v83_v28 = vmul.f32 0.6931472, %v165_v27 }
 0x13a   :  { %v86_v30 = vadd.f32 %v83_v28, %v66_v7 }
 0x13b   :  { %v167_v31 = vpop.eup %166 }
 0x13c   :  { %v85_v32 = vmul.f32 0.6931472, %v167_v31  ;;  %v108_v33 = vsub.f32 %v86_v30, %v104_v29 }
 0x13e   :  { %v87_v34 = vadd.f32 %v85_v32, %v69_v10  ;;  %v112_v37 = vsel %vm111_vm3, %v108_v33, 0.0 }
 0x140   :  { %v109_v36 = vsub.f32 %v87_v34, %v107_v35 }
 0x142   :  { %v113_v38 = vsel %vm111_vm3, %v109_v36, 0.0 }
 0x143   :  { %v114_v39 = vadd.f32 %v113_v38, %v112_v37 }
 0x145   :  { %115 = vadd.xlane.f32.xlu0 %v114_v39 }
 0x1ce   :  { %v116_v40 = vpop.xlane.xlu0 %115 }
 0x1cf   :  { %v117_v41 = vrot.slane %v116_v40, 4 }
 0x1d1   :  { %v118_v42 = vadd.f32 %v117_v41, %v116_v40 }
 0x1d3   :  { %v119_v43 = vrot.slane %v118_v42, 2 }
 0x1d5   :  { %v120_v44 = vadd.f32 %v119_v43, %v118_v42 }
 0x1d7   :  { %v121_v45 = vrot.slane %v120_v44, 1 }
 0x1d9   :  { %v122_v46 = vadd.f32 %v121_v45, %v120_v44 }
 0x1db   :  { %153 = vpush %v122_v46 }
 0x20c   :  { %s154_s17 = spop %153 }
 0x20d   :  { %v124_v47 = vstv %s154_s17 }
 0x20e   :  { %126 = vst [vmem:[#allocation2] sm:$0xff] %v124_v47 }
 0x20f   :  { %179 = shalt.err (!%p176_p4)
}
 0x210   :  { %136 = dma.vmem_to_hbm [thread:$0]  %s134_s1, 128, %s230_s2, [#allocation3]  }
 0x211   :  { %188 = dma.done.wait [#allocation3], 128  }
 0x212   :  { %189 = vsyncadd [#allocation3], 4294967168 }
 0x213   :  { %140 = vsyncpa [#allocation3], 1 }

</bundles_post_ra>
